<compile_context>
chip_gen: v7x
topology: tpu7x:2x2x1
jax: 0.10.0
libtpu: 0.0.40
codegen_flags: <defaults>
</compile_context>

<pallas_src>
import functools
import math

import jax
import jax.numpy as jnp
from jax.experimental import pallas as pl
from jax.experimental.pallas import tpu as pltpu

# Conservative VMEM budget: valid default scope on all generations incl. v7x.
_VMEM_LIMIT = 32 * 1024 * 1024


def _pick_tile(dim, preferred, align):
    """Largest multiple of `align` <= `preferred` that divides `dim`, else full dim."""
    if dim <= preferred:
        return dim
    t = (preferred // align) * align
    while t >= align:
        if dim % t == 0:
            return t
        t -= align
    return dim  # fall back to a full-extent block (always legal)


def _mm_compiler_params():
    return pltpu.CompilerParams(
        dimension_semantics=("parallel", "parallel", "arbitrary"),
        vmem_limit_bytes=_VMEM_LIMIT)


# ---------------------------------------------------------------------------
# RMSNorm
# ---------------------------------------------------------------------------
def _rmsnorm_kernel(x_ref, w_ref, o_ref, *, eps):
    x = x_ref[...].astype(jnp.float32)
    ms = jnp.mean(x * x, axis=-1, keepdims=True)
    inv = jax.lax.rsqrt(ms + eps)
    o_ref[...] = (x * inv * w_ref[...].astype(jnp.float32)).astype(o_ref.dtype)


def rmsnorm(x2d, w, eps):
    M, D = x2d.shape
    tm = _pick_tile(M, 512, 8)
    return pl.pallas_call(
        functools.partial(_rmsnorm_kernel, eps=eps),
        out_shape=jax.ShapeDtypeStruct((M, D), x2d.dtype),
        grid=(M // tm,),
        in_specs=[pl.BlockSpec((tm, D), lambda i: (i, 0)),
                  pl.BlockSpec((1, D), lambda i: (0, 0))],
        out_specs=pl.BlockSpec((tm, D), lambda i: (i, 0)),
        compiler_params=pltpu.CompilerParams(
            dimension_semantics=("parallel",),
            vmem_limit_bytes=_VMEM_LIMIT),
    )(x2d, w.reshape(1, D))


# ---------------------------------------------------------------------------
# Tiled linear:  out = x @ W_T + b   (+ optional fused residual add)
# ---------------------------------------------------------------------------
def _linear_kernel(x_ref, w_ref, b_ref, o_ref, acc_ref):
    @pl.when(pl.program_id(2) == 0)
    def _():
        acc_ref[...] = jnp.zeros_like(acc_ref)

    acc_ref[...] += jnp.dot(x_ref[...], w_ref[...],
                            preferred_element_type=jnp.float32)

    @pl.when(pl.program_id(2) == pl.num_programs(2) - 1)
    def _():
        o_ref[...] = (acc_ref[...]
                      + b_ref[...].astype(jnp.float32)).astype(o_ref.dtype)


def _linear_residual_kernel(x_ref, w_ref, b_ref, r_ref, o_ref, acc_ref):
    @pl.when(pl.program_id(2) == 0)
    def _():
        acc_ref[...] = jnp.zeros_like(acc_ref)

    acc_ref[...] += jnp.dot(x_ref[...], w_ref[...],
                            preferred_element_type=jnp.float32)

    @pl.when(pl.program_id(2) == pl.num_programs(2) - 1)
    def _():
        o_ref[...] = (acc_ref[...]
                      + b_ref[...].astype(jnp.float32)
                      + r_ref[...].astype(jnp.float32)).astype(o_ref.dtype)


def linear(x2d, wT, b, residual=None):
    """x2d: [M, K], wT: [K, N], b: [N], residual: optional [M, N]."""
    M, K = x2d.shape
    _, N = wT.shape
    tm = _pick_tile(M, 256, 8)
    tn = _pick_tile(N, 256, 128)
    tk = _pick_tile(K, 512, 128)
    grid = (M // tm, N // tn, K // tk)

    x_spec = pl.BlockSpec((tm, tk), lambda i, j, k: (i, k))
    w_spec = pl.BlockSpec((tk, tn), lambda i, j, k: (k, j))
    b_spec = pl.BlockSpec((1, tn), lambda i, j, k: (0, j))
    o_spec = pl.BlockSpec((tm, tn), lambda i, j, k: (i, j))
    scratch = [pltpu.VMEM((tm, tn), jnp.float32)]

    if residual is None:
        return pl.pallas_call(
            _linear_kernel,
            out_shape=jax.ShapeDtypeStruct((M, N), x2d.dtype),
            grid=grid,
            in_specs=[x_spec, w_spec, b_spec],
            out_specs=o_spec,
            scratch_shapes=scratch,
            compiler_params=_mm_compiler_params(),
        )(x2d, wT, b.reshape(1, N))

    r_spec = pl.BlockSpec((tm, tn), lambda i, j, k: (i, j))
    return pl.pallas_call(
        _linear_residual_kernel,
        out_shape=jax.ShapeDtypeStruct((M, N), x2d.dtype),
        grid=grid,
        in_specs=[x_spec, w_spec, b_spec, r_spec],
        out_specs=o_spec,
        scratch_shapes=scratch,
        compiler_params=_mm_compiler_params(),
    )(x2d, wT, b.reshape(1, N), residual)


# ---------------------------------------------------------------------------
# Fused Q/K/V projection (single pass over x, three MXU dots per tile)
# ---------------------------------------------------------------------------
def _qkv_kernel(x_ref, wq_ref, wk_ref, wv_ref, bq_ref, bk_ref, bv_ref,
                q_ref, k_ref, v_ref, accq, acck, accv):
    @pl.when(pl.program_id(2) == 0)
    def _():
        accq[...] = jnp.zeros_like(accq)
        acck[...] = jnp.zeros_like(acck)
        accv[...] = jnp.zeros_like(accv)

    x = x_ref[...]
    accq[...] += jnp.dot(x, wq_ref[...], preferred_element_type=jnp.float32)
    acck[...] += jnp.dot(x, wk_ref[...], preferred_element_type=jnp.float32)
    accv[...] += jnp.dot(x, wv_ref[...], preferred_element_type=jnp.float32)

    @pl.when(pl.program_id(2) == pl.num_programs(2) - 1)
    def _():
        q_ref[...] = (accq[...] + bq_ref[...].astype(jnp.float32)).astype(q_ref.dtype)
        k_ref[...] = (acck[...] + bk_ref[...].astype(jnp.float32)).astype(k_ref.dtype)
        v_ref[...] = (accv[...] + bv_ref[...].astype(jnp.float32)).astype(v_ref.dtype)


def qkv_projection(x2d, wqT, wkT, wvT, bq, bk, bv):
    M, K = x2d.shape
    N = wqT.shape[1]
    tm = _pick_tile(M, 256, 8)
    tn = _pick_tile(N, 256, 128)
    tk = _pick_tile(K, 512, 128)
    grid = (M // tm, N // tn, K // tk)

    x_spec = pl.BlockSpec((tm, tk), lambda i, j, k: (i, k))
    w_spec = pl.BlockSpec((tk, tn), lambda i, j, k: (k, j))
    b_spec = pl.BlockSpec((1, tn), lambda i, j, k: (0, j))
    o_spec = pl.BlockSpec((tm, tn), lambda i, j, k: (i, j))

    return pl.pallas_call(
        _qkv_kernel,
        out_shape=tuple(jax.ShapeDtypeStruct((M, N), x2d.dtype) for _ in range(3)),
        grid=grid,
        in_specs=[x_spec, w_spec, w_spec, w_spec, b_spec, b_spec, b_spec],
        out_specs=(o_spec, o_spec, o_spec),
        scratch_shapes=[pltpu.VMEM((tm, tn), jnp.float32)] * 3,
        compiler_params=_mm_compiler_params(),
    )(x2d, wqT, wkT, wvT, bq.reshape(1, N), bk.reshape(1, N), bv.reshape(1, N))


# ---------------------------------------------------------------------------
# Fused SwiGLU "up" projection:  (x@w1+b1) * silu(x@w2+b2)
# ---------------------------------------------------------------------------
def _swiglu_up_kernel(x_ref, w1_ref, w2_ref, b1_ref, b2_ref, o_ref, acc1, acc2):
    @pl.when(pl.program_id(2) == 0)
    def _():
        acc1[...] = jnp.zeros_like(acc1)
        acc2[...] = jnp.zeros_like(acc2)

    x = x_ref[...]
    acc1[...] += jnp.dot(x, w1_ref[...], preferred_element_type=jnp.float32)
    acc2[...] += jnp.dot(x, w2_ref[...], preferred_element_type=jnp.float32)

    @pl.when(pl.program_id(2) == pl.num_programs(2) - 1)
    def _():
        h1 = acc1[...] + b1_ref[...].astype(jnp.float32)
        h2 = acc2[...] + b2_ref[...].astype(jnp.float32)
        o_ref[...] = (h1 * (h2 * jax.nn.sigmoid(h2))).astype(o_ref.dtype)


def swiglu_up(x2d, w1T, w2T, b1, b2):
    M, K = x2d.shape
    F = w1T.shape[1]
    tm = _pick_tile(M, 256, 8)
    tn = _pick_tile(F, 256, 128)
    tk = _pick_tile(K, 512, 128)
    grid = (M // tm, F // tn, K // tk)

    x_spec = pl.BlockSpec((tm, tk), lambda i, j, k: (i, k))
    w_spec = pl.BlockSpec((tk, tn), lambda i, j, k: (k, j))
    b_spec = pl.BlockSpec((1, tn), lambda i, j, k: (0, j))
    o_spec = pl.BlockSpec((tm, tn), lambda i, j, k: (i, j))

    return pl.pallas_call(
        _swiglu_up_kernel,
        out_shape=jax.ShapeDtypeStruct((M, F), x2d.dtype),
        grid=grid,
        in_specs=[x_spec, w_spec, w_spec, b_spec, b_spec],
        out_specs=o_spec,
        scratch_shapes=[pltpu.VMEM((tm, tn), jnp.float32)] * 2,
        compiler_params=_mm_compiler_params(),
    )(x2d, w1T, w2T, b1.reshape(1, F), b2.reshape(1, F))


# ---------------------------------------------------------------------------
# Flash-style RoPE attention over [B, S, H*D] activations
# ---------------------------------------------------------------------------
def _flash_attn_kernel(q_ref, k_ref, v_ref, cosq_ref, sinq_ref, cosk_ref, sink_ref,
                       o_ref, m_scr, l_scr, acc_scr, *, head_dim, hpb):
    ki = pl.program_id(3)
    D = head_dim
    d2 = D // 2

    @pl.when(ki == 0)
    def _init():
        m_scr[...] = jnp.full(m_scr.shape, -jnp.inf, dtype=m_scr.dtype)
        l_scr[...] = jnp.zeros_like(l_scr)
        acc_scr[...] = jnp.zeros_like(acc_scr)

    cos_q = cosq_ref[...]   # [tq, D]  (scaled by 1/sqrt(D))
    sin_q = sinq_ref[...]   # [tq, D]  (sign of rotate_half folded in, scaled)
    cos_k = cosk_ref[...]   # [tkv, D]
    sin_k = sink_ref[...]   # [tkv, D] (sign folded in)

    def rope(x, cos, sin):
        # rotate_half = swap halves; its sign lives in the precomputed sin table.
        x_rot = jnp.concatenate([x[:, d2:], x[:, :d2]], axis=-1)
        return x * cos + x_rot * sin

    for h in range(hpb):                               # unrolled at trace time
        sl = slice(h * D, (h + 1) * D)
        q = rope(q_ref[:, sl].astype(jnp.float32), cos_q, sin_q)   # pre-scaled
        k = rope(k_ref[:, sl].astype(jnp.float32), cos_k, sin_k)
        v = v_ref[:, sl].astype(jnp.float32)

        # scores [tq, tkv] -- contraction over D, no explicit k transpose
        s = jax.lax.dot_general(q, k, (((1,), (1,)), ((), ())),
                                preferred_element_type=jnp.float32)

        m_prev = m_scr[:, h:h + 1]
        m_new = jnp.maximum(m_prev, jnp.max(s, axis=-1, keepdims=True))
        alpha = jnp.exp(m_prev - m_new)
        p = jnp.exp(s - m_new)
        l_scr[:, h:h + 1] = alpha * l_scr[:, h:h + 1] + jnp.sum(p, axis=-1,
                                                                keepdims=True)
        acc_scr[:, sl] = alpha * acc_scr[:, sl] + jnp.dot(
            p, v, preferred_element_type=jnp.float32)
        m_scr[:, h:h + 1] = m_new

    @pl.when(ki == pl.num_programs(3) - 1)
    def _finalize():
        inv_l = pl.reciprocal(l_scr[...], approx=True)   # EUP, not a VALU divide
        out = jnp.concatenate(
            [acc_scr[:, h * D:(h + 1) * D] * inv_l[:, h:h + 1] for h in range(hpb)],
            axis=-1)
        o_ref[...] = out.astype(o_ref.dtype)             # lane-dense store


def _heads_per_block(nhead, head_dim):
    # smallest head count whose combined width is a multiple of 128 lanes;
    # otherwise take all heads (block width == d_model == full array dim).
    for c in range(1, nhead + 1):
        if nhead % c == 0 and (c * head_dim) % 128 == 0:
            return c
    return nhead


def rotary_attention(q, k, v, cos_q, sin_q, cos_k, sin_k, nhead, head_dim):
    """q/k/v: [B, S, H*D] (head-interleaved along the last axis)."""
    B, Sq, dm = q.shape
    Sk = k.shape[1]
    hpb = _heads_per_block(nhead, head_dim)
    width = hpb * head_dim
    tq = _pick_tile(Sq, 256, 8)
    tkv = _pick_tile(Sk, 256, 8)
    grid = (B, nhead // hpb, Sq // tq, Sk // tkv)

    kernel = functools.partial(_flash_attn_kernel, head_dim=head_dim, hpb=hpb)
    return pl.pallas_call(
        kernel,
        out_shape=jax.ShapeDtypeStruct((B, Sq, dm), q.dtype),
        grid=grid,
        in_specs=[
            pl.BlockSpec((None, tq, width), lambda b, h, qi, ki: (b, qi, h)),
            pl.BlockSpec((None, tkv, width), lambda b, h, qi, ki: (b, ki, h)),
            pl.BlockSpec((None, tkv, width), lambda b, h, qi, ki: (b, ki, h)),
            pl.BlockSpec((tq, head_dim), lambda b, h, qi, ki: (qi, 0)),
            pl.BlockSpec((tq, head_dim), lambda b, h, qi, ki: (qi, 0)),
            pl.BlockSpec((tkv, head_dim), lambda b, h, qi, ki: (ki, 0)),
            pl.BlockSpec((tkv, head_dim), lambda b, h, qi, ki: (ki, 0)),
        ],
        out_specs=pl.BlockSpec((None, tq, width), lambda b, h, qi, ki: (b, qi, h)),
        scratch_shapes=[
            pltpu.VMEM((tq, hpb), jnp.float32),    # running max (per sub-head)
            pltpu.VMEM((tq, hpb), jnp.float32),    # running sum (per sub-head)
            pltpu.VMEM((tq, width), jnp.float32),  # output accumulator
        ],
        compiler_params=pltpu.CompilerParams(
            dimension_semantics=("parallel", "parallel", "parallel", "arbitrary"),
            vmem_limit_bytes=_VMEM_LIMIT),
    )(q, k, v, cos_q, sin_q, cos_k, sin_k)


def _rope_tables(seq_len, head_dim):
    """cos/sin tables with rotate_half sign and 1/sqrt(D) (q only) folded in."""
    inv_freq = 1.0 / (10000.0 ** (jnp.arange(0, head_dim, 2, dtype=jnp.float32)
                                  / head_dim))
    t = jnp.arange(seq_len, dtype=jnp.float32)
    freqs = jnp.einsum("i,j->ij", t, inv_freq)
    emb = jnp.concatenate([freqs, freqs], axis=-1)       # [S, D]
    cos = jnp.cos(emb)
    sin = jnp.sin(emb)
    sign = jnp.concatenate([-jnp.ones((head_dim // 2,), jnp.float32),
                            jnp.ones((head_dim // 2,), jnp.float32)])
    sin_signed = sin * sign
    scale = 1.0 / math.sqrt(head_dim)
    return cos * scale, sin_signed * scale, cos, sin_signed


# ---------------------------------------------------------------------------
# Full DiffusionTransformer forward (inference: dropout = identity, no masks)
# ---------------------------------------------------------------------------
def diffusion_transformer_forward(input_ids, params, cfg):
    B, S = input_ids.shape
    dm = cfg["d_model"]
    nhead = cfg["nhead"]
    head_dim = dm // nhead
    eps = cfg["eps"]
    assert head_dim % 2 == 0, "head_dim must be even for rotate_half"

    # TODO(synk): embedding token gather has no clean Pallas TPU equivalent
    # (data-dependent gather); kept in JAX glue via jnp.take.
    x = jnp.take(params["embedding"], input_ids, axis=0)          # [B, S, dm]

    cos_q, sin_q, cos_k, sin_k = _rope_tables(S, head_dim)

    x2 = x.reshape(B * S, dm)
    for lp in params["layers"]:
        # --- attention block (pre-norm, residual fused into out-proj) ---
        xn = rmsnorm(x2, lp["norm1_w"], eps)
        q, k, v = qkv_projection(xn, lp["wq_T"], lp["wk_T"], lp["wv_T"],
                                 lp["bq"], lp["bk"], lp["bv"])
        attn = rotary_attention(q.reshape(B, S, dm), k.reshape(B, S, dm),
                                v.reshape(B, S, dm),
                                cos_q, sin_q, cos_k, sin_k, nhead, head_dim)
        x2 = linear(attn.reshape(B * S, dm), lp["wo_T"], lp["bo"], residual=x2)

        # --- feed-forward block (SwiGLU, residual fused into down-proj) ---
        xn = rmsnorm(x2, lp["norm2_w"], eps)
        h = swiglu_up(xn, lp["w1_T"], lp["w2_T"], lp["b1"], lp["b2"])
        x2 = linear(h, lp["w3_T"], lp["b3"], residual=x2)

    x2 = rmsnorm(x2, params["norm_w"], eps)
    logits = linear(x2, params["out_w_T"], params["out_b"])
    return logits.reshape(B, S, -1)


# ---------------------------------------------------------------------------
# Pure-JAX reference (mirrors the PyTorch forward, eval mode)
# ---------------------------------------------------------------------------
def _rmsnorm_ref(x, w, eps):
    norm = jnp.sqrt(jnp.mean(x * x, axis=-1, keepdims=True) + eps)
    return w * (x / norm)


def _rotary_mha_ref(x, lp, nhead):
    B, S, dm = x.shape
    D = dm // nhead
    q = x @ lp["wq_T"] + lp["bq"]
    k = x @ lp["wk_T"] + lp["bk"]
    v = x @ lp["wv_T"] + lp["bv"]
    q = q.reshape(B, S, nhead, D)
    k = k.reshape(B, S, nhead, D)
    v = v.reshape(B, S, nhead, D)

    inv_freq = 1.0 / (10000.0 ** (jnp.arange(0, D, 2, dtype=jnp.float32) / D))
    t = jnp.arange(S, dtype=jnp.float32)
    freqs = jnp.einsum("i,j->ij", t, inv_freq)
    emb = jnp.concatenate([freqs, freqs], axis=-1)
    cos = jnp.cos(emb)[None, :, None, :]
    sin = jnp.sin(emb)[None, :, None, :]

    def rot_half(u):
        d2 = u.shape[-1] // 2
        return jnp.concatenate([-u[..., d2:], u[..., :d2]], axis=-1)

    q = q * cos + rot_half(q) * sin
    k = k * cos + rot_half(k) * sin

    q = q.transpose(0, 2, 1, 3) / math.sqrt(D)
    k = k.transpose(0, 2, 1, 3)
    v = v.transpose(0, 2, 1, 3)
    scores = jnp.einsum("bhqd,bhkd->bhqk", q, k)
    w = jax.nn.softmax(scores, axis=-1)
    attn = jnp.einsum("bhqk,bhkd->bhqd", w, v)
    attn = attn.transpose(0, 2, 1, 3).reshape(B, S, dm)
    return attn @ lp["wo_T"] + lp["bo"]


def reference_forward(input_ids, params, cfg):
    eps = cfg["eps"]
    x = params["embedding"][input_ids]
    for lp in params["layers"]:
        xn = _rmsnorm_ref(x, lp["norm1_w"], eps)
        x = x + _rotary_mha_ref(xn, lp, cfg["nhead"])
        xn = _rmsnorm_ref(x, lp["norm2_w"], eps)
        h1 = xn @ lp["w1_T"] + lp["b1"]
        h2 = xn @ lp["w2_T"] + lp["b2"]
        x = x + ((h1 * (h2 * jax.nn.sigmoid(h2))) @ lp["w3_T"] + lp["b3"])
    x = _rmsnorm_ref(x, params["norm_w"], eps)
    return x @ params["out_w_T"] + params["out_b"]


# ---------------------------------------------------------------------------
if __name__ == "__main__":
    cfg = dict(vocab_size=512, d_model=64, nhead=4, num_layers=2,
               dim_feedforward=128, eps=1e-6)
    B, S = 2, 16
    dm, ff, vocab = cfg["d_model"], cfg["dim_feedforward"], cfg["vocab_size"]

    root = jax.random.PRNGKey(0)

    def init_linear(key, fan_in, fan_out):
        kw, kb = jax.random.split(key)
        bound = 1.0 / math.sqrt(fan_in)
        w = jax.random.uniform(kw, (fan_in, fan_out), jnp.float32, -bound, bound)
        b = jax.random.uniform(kb, (fan_out,), jnp.float32, -bound, bound)
        return w, b

    keys = jax.random.split(root, cfg["num_layers"] + 4)
    layers = []
    for li in range(cfg["num_layers"]):
        lk = jax.random.split(keys[li], 9)
        wq, bq = init_linear(lk[0], dm, dm)
        wk, bk = init_linear(lk[1], dm, dm)
        wv, bv = init_linear(lk[2], dm, dm)
        wo, bo = init_linear(lk[3], dm, dm)
        w1, b1 = init_linear(lk[4], dm, ff)
        w2, b2 = init_linear(lk[5], dm, ff)
        w3, b3 = init_linear(lk[6], ff, dm)
        n1 = 1.0 + 0.1 * jax.random.normal(lk[7], (dm,), jnp.float32)
        n2 = 1.0 + 0.1 * jax.random.normal(lk[8], (dm,), jnp.float32)
        layers.append(dict(wq_T=wq, bq=bq, wk_T=wk, bk=bk, wv_T=wv, bv=bv,
                           wo_T=wo, bo=bo, w1_T=w1, b1=b1, w2_T=w2, b2=b2,
                           w3_T=w3, b3=b3, norm1_w=n1, norm2_w=n2))

    emb = 0.02 * jax.random.normal(keys[-4], (vocab, dm), jnp.float32)
    out_w, out_b = init_linear(keys[-3], dm, vocab)
    norm_w = 1.0 + 0.1 * jax.random.normal(keys[-2], (dm,), jnp.float32)
    params = dict(embedding=emb, layers=layers, norm_w=norm_w,
                  out_w_T=out_w, out_b=out_b)

    input_ids = jax.random.randint(keys[-1], (B, S), 0, vocab)

    out = diffusion_transformer_forward(input_ids, params, cfg)
    out = jax.block_until_ready(out)

    ref = reference_forward(input_ids, params, cfg)
    max_err = float(jnp.max(jnp.abs(out - ref)))
    assert out.shape == (B, S, vocab), out.shape
    assert max_err < 1e-2, f"max abs error {max_err}"

    print("KERNEL_OK")
</pallas_src>

<mosaic_0001>
module attributes {stable_mosaic.version = 11 : i64} {
  func.func @_rmsnorm_kernel(%arg0: i32, %arg1: memref<32x64xf32, #tpu.memory_space<vmem>>, %arg2: memref<1x64xf32, #tpu.memory_space<vmem>>, %arg3: memref<32x64xf32, #tpu.memory_space<vmem>>) attributes {dimension_semantics = [#tpu.dimension_semantics<parallel>], iteration_bounds = array<i64: 1>, scalar_prefetch = 0 : i64, scratch_operands = 0 : i64, tpu.core_type = #tpu.core_type<tc>, window_params = [{transform_indices = @transform_0, window_bounds = array<i64: 32, 64>}, {pipeline_mode = #tpu.pipeline_mode<synchronous>, transform_indices = @transform_1, window_bounds = array<i64: 1, 64>}, {transform_indices = @transform_2, window_bounds = array<i64: 32, 64>}]} {
    %c0 = arith.constant 0 : index
    %c0_0 = arith.constant 0 : index
    %0 = vector.load %arg1[%c0, %c0_0] : memref<32x64xf32, #tpu.memory_space<vmem>>, vector<32x64xf32>
    %1 = arith.mulf %0, %0 : vector<32x64xf32>
    %cst = arith.constant dense<0.000000e+00> : vector<32xf32>
    %2 = vector.multi_reduction <add>, %1, %cst [1] : vector<32x64xf32> to vector<32xf32>
    %3 = vector.shape_cast %2 : vector<32xf32> to vector<32x1xf32>
    %cst_1 = arith.constant 6.400000e+01 : f32
    %4 = vector.broadcast %cst_1 : f32 to vector<32x1xf32>
    %5 = arith.divf %3, %4 : vector<32x1xf32>
    %cst_2 = arith.constant 9.99999997E-7 : f32
    %6 = vector.broadcast %cst_2 : f32 to vector<32x1xf32>
    %7 = arith.addf %5, %6 : vector<32x1xf32>
    %8 = math.rsqrt %7 : vector<32x1xf32>
    %9 = vector.broadcast %8 : vector<32x1xf32> to vector<32x64xf32>
    %10 = arith.mulf %0, %9 : vector<32x64xf32>
    %c0_3 = arith.constant 0 : index
    %c0_4 = arith.constant 0 : index
    %11 = vector.load %arg2[%c0_3, %c0_4] : memref<1x64xf32, #tpu.memory_space<vmem>>, vector<1x64xf32>
    %12 = vector.broadcast %11 : vector<1x64xf32> to vector<32x64xf32>
    %13 = arith.mulf %10, %12 : vector<32x64xf32>
    %c0_5 = arith.constant 0 : index
    %c0_6 = arith.constant 0 : index
    %14 = vector.load %arg3[%c0_5, %c0_6] : memref<32x64xf32, #tpu.memory_space<vmem>>, vector<32x64xf32>
    tpu.vector_store %arg3[%c0_5, %c0_6], %13 {strides = array<i32>} : memref<32x64xf32, #tpu.memory_space<vmem>>, vector<32x64xf32>,
    return
  }
  func.func @transform_0(%arg0: i32) -> (i32, i32) {
    %c0_i32 = arith.constant 0 : i32
    %c0_i32_0 = arith.constant 0 : i32
    return %arg0, %c0_i32 : i32, i32
  }
  func.func @transform_1(%arg0: i32) -> (i32, i32) {
    %c0_i32 = arith.constant 0 : i32
    %c0_i32_0 = arith.constant 0 : i32
    %c0_i32_1 = arith.constant 0 : i32
    return %c0_i32, %c0_i32_0 : i32, i32
  }
  func.func @transform_2(%arg0: i32) -> (i32, i32) {
    %c0_i32 = arith.constant 0 : i32
    %c0_i32_0 = arith.constant 0 : i32
    return %arg0, %c0_i32 : i32, i32
  }
}

</mosaic_0001>

<bundles_post_ra>
// kernel: tpu_custom_call.1
= control target key start
LH: loop header
LB: loop body
LE: loop exit
PB: predicated region body
PF: predicated region fallthrough
CT: control target
= control target key end

     0   :  { %7 = vsyncpa [#allocation3], 0  ;;  %s217_s0 = inlined_call_operand.hbm [shape: f32[32,64], index: 0, kind: input, shape index: {}]   ;;  %s218_s1 = inlined_call_operand.vmem [shape: f32[1,64], index: 1, kind: input, shape index: {}]   ;;  %s219_s2 = inlined_call_operand.hbm [shape: f32[32,64], index: 2, kind: output, shape index: {}]  }
   0x1   :  { %8 = vsyncpa [#allocation4], 0  ;;  %s157_s9 = smov [#allocation2]   ;;  %s109_s13 = scalar_lea.hbm %s217_s0, 512 }
   0x2   :  { %s14_s10 = sshll.u32 %s157_s9, 4  ;;  %p110_p0 = scmp.ne.s32.totalorder %s217_s0, %s109_s13  ;;  %s15_s10 = int_to_ptr.vmem [resolvable:$true] %s14_s10 }
   0x3   :  { %p113_p1 = scmp.lt.u32.totalorder %s109_s13, %s217_s0 }
   0x5   :  { %p115_p2 = pnand %p113_p1, %p110_p0 }
   0x7   :  { %118 = shalt.err (!%p115_p2)
}
   0x8   :  { %s119_s18 = scalar_lea.vmem %s15_s10, 512  ;;  %p124_p4 = scmp.lt.s32.totalorder %s15_s10, %s15_s10 }
   0x9   :  { %p120_p3 = scmp.ne.s32.totalorder %s15_s10, %s119_s18  ;;  %p125_p5 = scmp.lt.s32.totalorder %s119_s18, %s119_s18 }
   0xb   :  { %p126_p6 = por %p125_p5, %p124_p4 }
   0xd   :  { %p127_p7 = pnand %p126_p6, %p120_p3 }
   0xf   :  { %130 = shalt.err (!%p127_p7)
}
  0x10   :  { %s158_s19 = smov 128   ;;  %s159_s20 = smov 8  }
  0x11   :  { %20 = dma.hbm_to_vmem [thread:$0]  %s217_s0, 512, %s15_s10, [#allocation3], %s158_s19, %s158_s19, %s159_s20  }
  0x12   :  { %153 = dma.done.wait [#allocation3], 512  }
  0x13   :  { %154 = vsyncadd [#allocation3], 4294966784  ;;  %v28_v0 = vld [vmem:[#allocation2 + $0x10] sm:$0xff]  ;;  %vm34_vm0 = vcmask 523264   ;;  %v26_v1 = vld [vmem:[#allocation2] sm:$0xff]  ;;  %s160_s24 = smov [#allocation5]  }
  0x14   :  { %v29_v2 = vld [vmem:[#allocation2 + $0x18] sm:$0xff]  ;;  %v32_v3 = vmul.f32 %v28_v0, %v28_v0  ;;  %v30_v4 = vmul.f32 %v26_v1, %v26_v1  ;;  %v27_v6 = vld [vmem:[#allocation2 + $0x8] sm:$0xff]  ;;  %v96_v25 = vld [vmem:[%s218_s1] ss:$0 sm:$0xff]  ;;  %s84_s25 = sshll.u32 %s160_s24, 4  ;;  %s85_s25 = int_to_ptr.vmem [resolvable:$true] %s84_s25 }
  0x15   :  { %v33_v5 = vmul.f32 %v29_v2, %v29_v2  ;;  %v31_v7 = vmul.f32 %v27_v6, %v27_v6  ;;  %s131_s1 = scalar_lea.vmem %s85_s25, 512  ;;  %p136_p9 = scmp.lt.s32.totalorder %s85_s25, %s85_s25 }
  0x16   :  { %v41_v8 = vsel %vm34_vm0, %v32_v3, 0.0  ;;  %v35_v9 = vsel %vm34_vm0, %v30_v4, 0.0  ;;  %p132_p8 = scmp.ne.s32.totalorder %s85_s25, %s131_s1  ;;  %p137_p10 = scmp.lt.s32.totalorder %s131_s1, %s131_s1 }
  0x17   :  { %42 = vadd.xlane.f32.xlu1 %v41_v8  ;;  %36 = vadd.xlane.f32.xlu0 %v35_v9  ;;  %v44_v10 = vsel %vm34_vm0, %v33_v5, 0.0  ;;  %v38_v11 = vsel %vm34_vm0, %v31_v7, 0.0 }
  0x18   :  { %p138_p11 = por %p137_p10, %p136_p9 }
  0x1a   :  { %p139_p12 = pnand %p138_p11, %p132_p8 }
  0x1b   :  { %45 = vadd.xlane.f32.xlu1 %v44_v10  ;;  %39 = vadd.xlane.f32.xlu0 %v38_v11 }
  0xa4   :  { %v43_v12 = vpop.xlane.xlu1 %42  ;;  %v37_v13 = vpop.xlane.xlu0 %36 }
  0xa5   :  { %v50_v14 = vmul.f32 0.015625, %v43_v12  ;;  %v48_v15 = vmul.f32 0.015625, %v37_v13 }
  0xa7   :  { %v54_v16 = vadd.f32 1e-06, %v50_v14  ;;  %v52_v17 = vadd.f32 1e-06, %v48_v15 }
  0xa8   :  { %v46_v18 = vpop.xlane.xlu1 %45  ;;  %v40_v19 = vpop.xlane.xlu0 %39 }
  0xa9   :  { %101 = vrsqrt.f32 %v54_v16  ;;  %v51_v20 = vmul.f32 0.015625, %v46_v18  ;;  %v49_v21 = vmul.f32 0.015625, %v40_v19 }
  0xaa   :  { %103 = vrsqrt.f32 %v52_v17 }
  0xab   :  { %v55_v22 = vadd.f32 1e-06, %v51_v20  ;;  %v53_v23 = vadd.f32 1e-06, %v49_v21 }
  0xad   :  { %105 = vrsqrt.f32 %v55_v22 }
  0xae   :  { %107 = vrsqrt.f32 %v53_v23 }
  0xb3   :  { %v102_v24 = vpop.eup %101 }
  0xb4   :  { %v104_v26 = vpop.eup %103  ;;  %v62_v27 = vmul.f32 %v102_v24, %v28_v0 }
  0xb5   :  { %v60_v28 = vmul.f32 %v104_v26, %v26_v1 }
  0xb6   :  { %v73_v29 = vmul.f32 %v96_v25, %v62_v27 }
  0xb7   :  { %v106_v30 = vpop.eup %105  ;;  %v71_v31 = vmul.f32 %v96_v25, %v60_v28 }
  0xb8   :  { %v108_v32 = vpop.eup %107  ;;  %v63_v33 = vmul.f32 %v106_v30, %v29_v2  ;;  %77 = vst.msk [vmem:[#allocation5 + $0x10] sm:$0xff] %vm34_vm0, %v73_v29 }
  0xb9   :  { %v61_v34 = vmul.f32 %v108_v32, %v27_v6  ;;  %75 = vst.msk [vmem:[#allocation5] sm:$0xff] %vm34_vm0, %v71_v31 }
  0xba   :  { %v74_v35 = vmul.f32 %v96_v25, %v63_v33 }
  0xbb   :  { %v72_v36 = vmul.f32 %v96_v25, %v61_v34 }
  0xbc   :  { %78 = vst.msk [vmem:[#allocation5 + $0x18] sm:$0xff] %vm34_vm0, %v74_v35 }
  0xbd   :  { %76 = vst.msk [vmem:[#allocation5 + $0x8] sm:$0xff] %vm34_vm0, %v72_v36 }
  0xbe   :  { %142 = shalt.err (!%p139_p12)
}
  0xbf   :  { %s143_s28 = scalar_lea.hbm %s219_s2, 512 }
  0xc0   :  { %p144_p13 = scmp.ne.s32.totalorder %s219_s2, %s143_s28  ;;  %p147_p0 = scmp.lt.u32.totalorder %s143_s28, %s219_s2 }
  0xc2   :  { %p149_p1 = pnand %p147_p0, %p144_p13 }
  0xc4   :  { %152 = shalt.err (!%p149_p1)
}
  0xc5   :  { %90 = dma.vmem_to_hbm [thread:$0]  %s85_s25, 512, %s219_s2, [#allocation4], %s158_s19, %s158_s19, %s159_s20  }
  0xc6   :  { %155 = dma.done.wait [#allocation4], 512  }
  0xc7   :  { %156 = vsyncadd [#allocation4], 4294966784 }
  0xc8   :  { %94 = vsyncpa [#allocation3], 1 }
  0xc9   :  { %95 = vsyncpa [#allocation4], 1 }

</bundles_post_ra>
